<compile_context>
chip_gen: v7x
topology: tpu7x:2x2x1
jax: 0.10.0
libtpu: 0.0.40
codegen_flags: <defaults>
</compile_context>

<pallas_src>
import functools

import jax
import jax.numpy as jnp
import numpy as np
from jax.experimental import pallas as pl
from jax.experimental.pallas import tpu as pltpu


# ----------------------------- config ---------------------------------------
VOCAB_DIM = 32
EMBEDDING_DIM = 32                      # -> class/bbox embed dim = 16
MLP_CONFIG = (64, 32)                   # two hidden layers (fixed in kernel)
BATCH = 16

# packed slab layout: (136, 128) f32, all row offsets multiples of 8
_R_WCLS = 0      # rows   0:32,  cols 0:16  folded class weight (w_ci @ w_ce)
_R_WBM  = 32     # rows  32:40,  cols 0:8   bbox_mapping, zero-padded 4->8
_R_W0C  = 40     # rows  40:56,  cols 0:128 [w0_src_cls | w0_tgt_cls]
_R_W0B  = 56     # rows  56:64,  cols 0:128 [w0_src_bb_fold | w0_tgt_bb_fold] (padded)
_R_W1   = 64     # rows  64:128, cols 0:32  MLP layer 1
_R_BIAS = 128    # row 128 b_cls | 129 b_bm | 130 b0 | 131 b1 | 132 head row | 133 head bias
_W_ROWS = 136
_W_COLS = 128


# ----------------------------- kernel ---------------------------------------
def _mlp_soft_class_kernel(src_cls_ref, tgt_cls_ref, src_bbox_ref, tgt_bbox_ref,
                           w_ref, out_ref, cls_buf, bb_buf,
                           *, batch: int, apply_sigmoid: bool):
    B = batch
    relu = lambda v: jnp.maximum(v, 0.0)

    # ---- stack src/tgt along sublanes in VMEM scratch (no wrapper copies) ----
    cls_buf[0:B, :] = src_cls_ref[...]
    cls_buf[B:2 * B, :] = tgt_cls_ref[...]
    bb_buf[...] = jnp.zeros_like(bb_buf)          # zero-pad bbox lanes 4:8
    bb_buf[0:B, 0:4] = src_bbox_ref[...]
    bb_buf[B:2 * B, 0:4] = tgt_bbox_ref[...]
    cls_x = cls_buf[...]                          # (2B, 32)
    bb_x = bb_buf[...]                            # (2B, 8)

    # ---- shared class branch (class_intermediate folded into class_embed) ----
    cls_h = relu(jnp.dot(cls_x, w_ref[_R_WCLS:_R_WCLS + 32, 0:16],
                         preferred_element_type=jnp.float32)
                 + w_ref[_R_BIAS + 0:_R_BIAS + 1, 0:16])          # (2B, 16)

    # ---- shared bbox_mapping branch (padded 4->8 features) ----
    bb_h = relu(jnp.dot(bb_x, w_ref[_R_WBM:_R_WBM + 8, 0:8],
                        preferred_element_type=jnp.float32)
                + w_ref[_R_BIAS + 1:_R_BIAS + 2, 0:8])            # (2B, 8)

    # ---- MLP layer 0 over the implicit concat: two fused 128-lane matmuls ----
    c_res = jnp.dot(cls_h, w_ref[_R_W0C:_R_W0C + 16, 0:128],
                    preferred_element_type=jnp.float32)            # (2B, 128)
    b_res = jnp.dot(bb_h, w_ref[_R_W0B:_R_W0B + 8, 0:128],
                    preferred_element_type=jnp.float32)            # (2B, 128)
    h = relu(c_res[0:B, 0:64] + c_res[B:2 * B, 64:128]
             + b_res[0:B, 0:64] + b_res[B:2 * B, 64:128]
             + w_ref[_R_BIAS + 2:_R_BIAS + 3, 0:64])               # (B, 64)

    # ---- MLP layer 1 ----
    h = relu(jnp.dot(h, w_ref[_R_W1:_R_W1 + 64, 0:32],
                     preferred_element_type=jnp.float32)
             + w_ref[_R_BIAS + 3:_R_BIAS + 4, 0:32])               # (B, 32)

    # ---- head on VPU/XLU (no N=1 MXU pass) ----
    out = (jnp.sum(h * w_ref[_R_BIAS + 4:_R_BIAS + 5, 0:32],
                   axis=-1, keepdims=True)
           + w_ref[_R_BIAS + 5:_R_BIAS + 6, 0:1])                  # (B, 1)
    if apply_sigmoid:
        out = jax.nn.sigmoid(out)
    out_ref[...] = out.astype(out_ref.dtype)


# ----------------------------- parameters -----------------------------------
def _linear_init(key, fan_in, fan_out):
    """PyTorch-style default Linear init; W as (in, out), b as (1, out)."""
    kw, kb = jax.random.split(key)
    bound = 1.0 / np.sqrt(fan_in)
    w = jax.random.uniform(kw, (fan_in, fan_out), jnp.float32, -bound, bound)
    b = jax.random.uniform(kb, (1, fan_out), jnp.float32, -bound, bound)
    return w, b


def init_params(key):
    e2 = EMBEDDING_DIM // 2
    keys = jax.random.split(key, 7)
    p = {}
    p["w_ci"], p["b_ci"] = _linear_init(keys[0], VOCAB_DIM, VOCAB_DIM)
    p["w_ce"], p["b_ce"] = _linear_init(keys[1], VOCAB_DIM, e2)
    p["w_bm"], p["b_bm"] = _linear_init(keys[2], 4, 4)
    p["w_be"], p["b_be"] = _linear_init(keys[3], 4, e2)
    p["w0"],   p["b0"]   = _linear_init(keys[4], EMBEDDING_DIM * 2, MLP_CONFIG[0])
    p["w1"],   p["b1"]   = _linear_init(keys[5], MLP_CONFIG[0], MLP_CONFIG[1])
    p["wh"],   p["bh"]   = _linear_init(keys[6], MLP_CONFIG[1], 1)
    return p


# ----------------------------- weight packing (once, host-side) -------------
def pack_params(params):
    """Fold linear-linear pairs and pack everything into one (136,128) slab."""
    p = {k: np.asarray(v, np.float32) for k, v in params.items()}
    e2 = EMBEDDING_DIM // 2  # 16

    # fold class_intermediate into class_embed (no ReLU in between)
    w_cls = p["w_ci"] @ p["w_ce"]                               # (32, 16)
    b_cls = p["b_ci"] @ p["w_ce"] + p["b_ce"]                   # (1, 16)

    # layer-0 rows by concat order: [src_bbox | src_cls | tgt_bbox | tgt_cls]
    w0 = p["w0"]
    w0_sb = w0[0 * e2:1 * e2]
    w0_sc = w0[1 * e2:2 * e2]
    w0_tb = w0[2 * e2:3 * e2]
    w0_tc = w0[3 * e2:4 * e2]

    # fold bbox_embed into layer-0 bbox partials (no ReLU after bbox_embed)
    w0_sb_f = p["w_be"] @ w0_sb                                 # (4, 64)
    w0_tb_f = p["w_be"] @ w0_tb                                 # (4, 64)
    b0_f = p["b0"] + p["b_be"] @ (w0_sb + w0_tb)                # (1, 64)

    # zero-pad bbox path 4 -> 8 features (sublane alignment)
    w_bm_p = np.zeros((8, 8), np.float32); w_bm_p[:4, :4] = p["w_bm"]
    b_bm_p = np.zeros((8,), np.float32);   b_bm_p[:4] = p["b_bm"][0]
    w0_sb_fp = np.zeros((8, MLP_CONFIG[0]), np.float32); w0_sb_fp[:4] = w0_sb_f
    w0_tb_fp = np.zeros((8, MLP_CONFIG[0]), np.float32); w0_tb_fp[:4] = w0_tb_f

    slab = np.zeros((_W_ROWS, _W_COLS), np.float32)
    slab[_R_WCLS:_R_WCLS + 32, 0:16] = w_cls
    slab[_R_WBM:_R_WBM + 8, 0:8] = w_bm_p
    slab[_R_W0C:_R_W0C + 16, 0:128] = np.concatenate([w0_sc, w0_tc], axis=1)
    slab[_R_W0B:_R_W0B + 8, 0:128] = np.concatenate([w0_sb_fp, w0_tb_fp], axis=1)
    slab[_R_W1:_R_W1 + 64, 0:32] = p["w1"]
    slab[_R_BIAS + 0, 0:16] = b_cls[0]
    slab[_R_BIAS + 1, 0:8] = b_bm_p
    slab[_R_BIAS + 2, 0:64] = b0_f[0]
    slab[_R_BIAS + 3, 0:32] = p["b1"][0]
    slab[_R_BIAS + 4, 0:32] = p["wh"][:, 0]     # head weight as a row
    slab[_R_BIAS + 5, 0] = p["bh"][0, 0]
    return jnp.asarray(slab)


# ----------------------------- wrapper ---------------------------------------
@functools.partial(jax.jit, static_argnames=("apply_sigmoid",))
def mlp_soft_class_forward(packed, batch, apply_sigmoid=False):
    src_cls = batch["source_class"].astype(jnp.float32)
    tgt_cls = batch["target_class"].astype(jnp.float32)
    src_bbox = batch["source_bbox"].astype(jnp.float32)
    tgt_bbox = batch["target_bbox"].astype(jnp.float32)

    b = src_cls.shape[0]
    pad = (-b) % 8
    if pad:  # pad batch to a sublane multiple (sliced back below)
        pad_rows = lambda x: jnp.pad(x, ((0, pad), (0, 0)))
        src_cls, tgt_cls = pad_rows(src_cls), pad_rows(tgt_cls)
        src_bbox, tgt_bbox = pad_rows(src_bbox), pad_rows(tgt_bbox)
    bp = b + pad

    kernel = functools.partial(_mlp_soft_class_kernel,
                               batch=bp, apply_sigmoid=apply_sigmoid)
    vmem = lambda: pl.BlockSpec(memory_space=pltpu.MemorySpace.VMEM)

    out = pl.pallas_call(
        kernel,
        out_shape=jax.ShapeDtypeStruct((bp, 1), jnp.float32),
        in_specs=[vmem(), vmem(), vmem(), vmem(), vmem()],
        out_specs=vmem(),
        scratch_shapes=[pltpu.VMEM((2 * bp, VOCAB_DIM), jnp.float32),
                        pltpu.VMEM((2 * bp, 8), jnp.float32)],
    )(src_cls, tgt_cls, src_bbox, tgt_bbox, packed)
    return out[:b]


# ----------------------------- pure-JAX reference ----------------------------
def reference_forward(params, batch, apply_sigmoid=False):
    relu = lambda v: jnp.maximum(v, 0.0)
    lin = lambda x, w, bb: x @ w + bb

    s_cls = relu(lin(lin(batch["source_class"], params["w_ci"], params["b_ci"]),
                     params["w_ce"], params["b_ce"]))
    t_cls = relu(lin(lin(batch["target_class"], params["w_ci"], params["b_ci"]),
                     params["w_ce"], params["b_ce"]))
    s_bb = lin(relu(lin(batch["source_bbox"], params["w_bm"], params["b_bm"])),
               params["w_be"], params["b_be"])
    t_bb = lin(relu(lin(batch["target_bbox"], params["w_bm"], params["b_bm"])),
               params["w_be"], params["b_be"])
    combined = jnp.concatenate([s_bb, s_cls, t_bb, t_cls], axis=-1)
    h = relu(lin(combined, params["w0"], params["b0"]))
    h = relu(lin(h, params["w1"], params["b1"]))
    out = lin(h, params["wh"], params["bh"])
    return jax.nn.sigmoid(out) if apply_sigmoid else out


# ----------------------------- main -------------------------------------------
if __name__ == "__main__":
    key = jax.random.PRNGKey(0)
    k_params, k_sc, k_tc, k_sb, k_tb = jax.random.split(key, 5)

    params = init_params(k_params)
    packed = pack_params(params)        # one-time, off the per-call path

    batch = {
        "source_class": jax.random.normal(k_sc, (BATCH, VOCAB_DIM), jnp.float32),
        "target_class": jax.random.normal(k_tc, (BATCH, VOCAB_DIM), jnp.float32),
        "source_bbox":  jax.random.uniform(k_sb, (BATCH, 4), jnp.float32),
        "target_bbox":  jax.random.uniform(k_tb, (BATCH, 4), jnp.float32),
    }

    out = jax.block_until_ready(
        mlp_soft_class_forward(packed, batch, apply_sigmoid=False))
    ref = reference_forward(params, batch, apply_sigmoid=False)
    # folded weights are exact up to fp reassociation (~1e-6-level diffs)
    np.testing.assert_allclose(np.asarray(out), np.asarray(ref),
                               rtol=1e-4, atol=1e-5)

    out_sig = jax.block_until_ready(
        mlp_soft_class_forward(packed, batch, apply_sigmoid=True))
    ref_sig = reference_forward(params, batch, apply_sigmoid=True)
    np.testing.assert_allclose(np.asarray(out_sig), np.asarray(ref_sig),
                               rtol=1e-4, atol=1e-5)

    print("KERNEL_OK")
</pallas_src>

<mosaic_0001>
module attributes {stable_mosaic.version = 11 : i64} {
  func.func @_mlp_soft_class_kernel(%arg0: memref<16x32xf32, #tpu.memory_space<vmem>>, %arg1: memref<16x32xf32, #tpu.memory_space<vmem>>, %arg2: memref<16x4xf32, #tpu.memory_space<vmem>>, %arg3: memref<16x4xf32, #tpu.memory_space<vmem>>, %arg4: memref<136x128xf32, #tpu.memory_space<vmem>>, %arg5: memref<16x1xf32, #tpu.memory_space<vmem>>, %arg6: memref<32x32xf32, #tpu.memory_space<vmem>>, %arg7: memref<32x8xf32, #tpu.memory_space<vmem>>) attributes {dimension_semantics = [], scalar_prefetch = 0 : i64, scratch_operands = 2 : i64, tpu.core_type = #tpu.core_type<tc>} {
    %c0 = arith.constant 0 : index
    %c0_0 = arith.constant 0 : index
    %0 = vector.load %arg0[%c0, %c0_0] : memref<16x32xf32, #tpu.memory_space<vmem>>, vector<16x32xf32>
    %c0_1 = arith.constant 0 : index
    %c0_2 = arith.constant 0 : index
    %1 = vector.load %arg6[%c0_1, %c0_2] : memref<32x32xf32, #tpu.memory_space<vmem>>, vector<16x32xf32>
    tpu.vector_store %arg6[%c0_1, %c0_2], %0 {strides = array<i32>} : memref<32x32xf32, #tpu.memory_space<vmem>>, vector<16x32xf32>,
    %c0_3 = arith.constant 0 : index
    %c0_4 = arith.constant 0 : index
    %2 = vector.load %arg1[%c0_3, %c0_4] : memref<16x32xf32, #tpu.memory_space<vmem>>, vector<16x32xf32>
    %c16 = arith.constant 16 : index
    %c0_5 = arith.constant 0 : index
    %3 = vector.load %arg6[%c16, %c0_5] : memref<32x32xf32, #tpu.memory_space<vmem>>, vector<16x32xf32>
    tpu.vector_store %arg6[%c16, %c0_5], %2 {strides = array<i32>} : memref<32x32xf32, #tpu.memory_space<vmem>>, vector<16x32xf32>,
    %cst = arith.constant 0.000000e+00 : f32
    %4 = vector.broadcast %cst : f32 to vector<32x8xf32>
    %c0_6 = arith.constant 0 : index
    %c0_7 = arith.constant 0 : index
    %5 = vector.load %arg7[%c0_6, %c0_7] : memref<32x8xf32, #tpu.memory_space<vmem>>, vector<32x8xf32>
    tpu.vector_store %arg7[%c0_6, %c0_7], %4 {strides = array<i32>} : memref<32x8xf32, #tpu.memory_space<vmem>>, vector<32x8xf32>,
    %c0_8 = arith.constant 0 : index
    %c0_9 = arith.constant 0 : index
    %6 = vector.load %arg2[%c0_8, %c0_9] : memref<16x4xf32, #tpu.memory_space<vmem>>, vector<16x4xf32>
    %c0_10 = arith.constant 0 : index
    %c0_11 = arith.constant 0 : index
    %7 = vector.load %arg7[%c0_10, %c0_11] : memref<32x8xf32, #tpu.memory_space<vmem>>, vector<16x4xf32>
    tpu.vector_store %arg7[%c0_10, %c0_11], %6 {strides = array<i32>} : memref<32x8xf32, #tpu.memory_space<vmem>>, vector<16x4xf32>,
    %c0_12 = arith.constant 0 : index
    %c0_13 = arith.constant 0 : index
    %8 = vector.load %arg3[%c0_12, %c0_13] : memref<16x4xf32, #tpu.memory_space<vmem>>, vector<16x4xf32>
    %c16_14 = arith.constant 16 : index
    %c0_15 = arith.constant 0 : index
    %9 = vector.load %arg7[%c16_14, %c0_15] : memref<32x8xf32, #tpu.memory_space<vmem>>, vector<16x4xf32>
    tpu.vector_store %arg7[%c16_14, %c0_15], %8 {strides = array<i32>} : memref<32x8xf32, #tpu.memory_space<vmem>>, vector<16x4xf32>,
    %c0_16 = arith.constant 0 : index
    %c0_17 = arith.constant 0 : index
    %10 = vector.load %arg6[%c0_16, %c0_17] : memref<32x32xf32, #tpu.memory_space<vmem>>, vector<32x32xf32>
    %c0_18 = arith.constant 0 : index
    %c0_19 = arith.constant 0 : index
    %11 = vector.load %arg7[%c0_18, %c0_19] : memref<32x8xf32, #tpu.memory_space<vmem>>, vector<32x8xf32>
    %c0_20 = arith.constant 0 : index
    %c0_21 = arith.constant 0 : index
    %12 = vector.load %arg4[%c0_20, %c0_21] : memref<136x128xf32, #tpu.memory_space<vmem>>, vector<32x16xf32>
    %cst_22 = arith.constant dense<0.000000e+00> : vector<32x16xf32>
    %13 = tpu.matmul %10, %12, %cst_22 {dimension_numbers = #tpu.dot_dimension_numbers<[1], [0], [0], [1], [0, 0, 1, 1], [], []>} : vector<32x32xf32>, vector<32x16xf32>, vector<32x16xf32> -> vector<32x16xf32>
    %c128 = arith.constant 128 : index
    %c0_23 = arith.constant 0 : index
    %14 = vector.load %arg4[%c128, %c0_23] : memref<136x128xf32, #tpu.memory_space<vmem>>, vector<1x16xf32>
    %15 = vector.broadcast %14 : vector<1x16xf32> to vector<32x16xf32>
    %16 = arith.addf %13, %15 : vector<32x16xf32>
    %cst_24 = arith.constant 0.000000e+00 : f32
    %17 = vector.broadcast %cst_24 : f32 to vector<32x16xf32>
    %18 = arith.maximumf %16, %17 : vector<32x16xf32>
    %c32 = arith.constant 32 : index
    %c0_25 = arith.constant 0 : index
    %19 = vector.load %arg4[%c32, %c0_25] : memref<136x128xf32, #tpu.memory_space<vmem>>, vector<8x8xf32>
    %cst_26 = arith.constant dense<0.000000e+00> : vector<32x8xf32>
    %20 = tpu.matmul %11, %19, %cst_26 {dimension_numbers = #tpu.dot_dimension_numbers<[1], [0], [0], [1], [0, 0, 1, 1], [], []>} : vector<32x8xf32>, vector<8x8xf32>, vector<32x8xf32> -> vector<32x8xf32>
    %c129 = arith.constant 129 : index
    %c0_27 = arith.constant 0 : index
    %21 = vector.load %arg4[%c129, %c0_27] : memref<136x128xf32, #tpu.memory_space<vmem>>, vector<1x8xf32>
    %22 = vector.broadcast %21 : vector<1x8xf32> to vector<32x8xf32>
    %23 = arith.addf %20, %22 : vector<32x8xf32>
    %cst_28 = arith.constant 0.000000e+00 : f32
    %24 = vector.broadcast %cst_28 : f32 to vector<32x8xf32>
    %25 = arith.maximumf %23, %24 : vector<32x8xf32>
    %c40 = arith.constant 40 : index
    %c0_29 = arith.constant 0 : index
    %26 = vector.load %arg4[%c40, %c0_29] : memref<136x128xf32, #tpu.memory_space<vmem>>, vector<16x128xf32>
    %cst_30 = arith.constant dense<0.000000e+00> : vector<32x128xf32>
    %27 = tpu.matmul %18, %26, %cst_30 {dimension_numbers = #tpu.dot_dimension_numbers<[1], [0], [0], [1], [0, 0, 1, 1], [], []>} : vector<32x16xf32>, vector<16x128xf32>, vector<32x128xf32> -> vector<32x128xf32>
    %c56 = arith.constant 56 : index
    %c0_31 = arith.constant 0 : index
    %28 = vector.load %arg4[%c56, %c0_31] : memref<136x128xf32, #tpu.memory_space<vmem>>, vector<8x128xf32>
    %cst_32 = arith.constant dense<0.000000e+00> : vector<32x128xf32>
    %29 = tpu.matmul %25, %28, %cst_32 {dimension_numbers = #tpu.dot_dimension_numbers<[1], [0], [0], [1], [0, 0, 1, 1], [], []>} : vector<32x8xf32>, vector<8x128xf32>, vector<32x128xf32> -> vector<32x128xf32>
    %30 = vector.extract_strided_slice %27 {offsets = [0, 0], sizes = [16, 64], strides = [1, 1]} : vector<32x128xf32> to vector<16x64xf32>
    %31 = vector.extract_strided_slice %27 {offsets = [16, 64], sizes = [16, 64], strides = [1, 1]} : vector<32x128xf32> to vector<16x64xf32>
    %32 = arith.addf %30, %31 : vector<16x64xf32>
    %33 = vector.extract_strided_slice %29 {offsets = [0, 0], sizes = [16, 64], strides = [1, 1]} : vector<32x128xf32> to vector<16x64xf32>
    %34 = arith.addf %32, %33 : vector<16x64xf32>
    %35 = vector.extract_strided_slice %29 {offsets = [16, 64], sizes = [16, 64], strides = [1, 1]} : vector<32x128xf32> to vector<16x64xf32>
    %36 = arith.addf %34, %35 : vector<16x64xf32>
    %c130 = arith.constant 130 : index
    %c0_33 = arith.constant 0 : index
    %37 = vector.load %arg4[%c130, %c0_33] : memref<136x128xf32, #tpu.memory_space<vmem>>, vector<1x64xf32>
    %38 = vector.broadcast %37 : vector<1x64xf32> to vector<16x64xf32>
    %39 = arith.addf %36, %38 : vector<16x64xf32>
    %cst_34 = arith.constant 0.000000e+00 : f32
    %40 = vector.broadcast %cst_34 : f32 to vector<16x64xf32>
    %41 = arith.maximumf %39, %40 : vector<16x64xf32>
    %c64 = arith.constant 64 : index
    %c0_35 = arith.constant 0 : index
    %42 = vector.load %arg4[%c64, %c0_35] : memref<136x128xf32, #tpu.memory_space<vmem>>, vector<64x32xf32>
    %cst_36 = arith.constant dense<0.000000e+00> : vector<16x32xf32>
    %43 = tpu.matmul %41, %42, %cst_36 {dimension_numbers = #tpu.dot_dimension_numbers<[1], [0], [0], [1], [0, 0, 1, 1], [], []>} : vector<16x64xf32>, vector<64x32xf32>, vector<16x32xf32> -> vector<16x32xf32>
    %c131 = arith.constant 131 : index
    %c0_37 = arith.constant 0 : index
    %44 = vector.load %arg4[%c131, %c0_37] : memref<136x128xf32, #tpu.memory_space<vmem>>, vector<1x32xf32>
    %45 = vector.broadcast %44 : vector<1x32xf32> to vector<16x32xf32>
    %46 = arith.addf %43, %45 : vector<16x32xf32>
    %cst_38 = arith.constant 0.000000e+00 : f32
    %47 = vector.broadcast %cst_38 : f32 to vector<16x32xf32>
    %48 = arith.maximumf %46, %47 : vector<16x32xf32>
    %c132 = arith.constant 132 : index
    %c0_39 = arith.constant 0 : index
    %49 = vector.load %arg4[%c132, %c0_39] : memref<136x128xf32, #tpu.memory_space<vmem>>, vector<1x32xf32>
    %50 = vector.broadcast %49 : vector<1x32xf32> to vector<16x32xf32>
    %51 = arith.mulf %48, %50 : vector<16x32xf32>
    %cst_40 = arith.constant dense<0.000000e+00> : vector<16xf32>
    %52 = vector.multi_reduction <add>, %51, %cst_40 [1] : vector<16x32xf32> to vector<16xf32>
    %53 = vector.shape_cast %52 : vector<16xf32> to vector<16x1xf32>
    %c133 = arith.constant 133 : index
    %c0_41 = arith.constant 0 : index
    %54 = vector.load %arg4[%c133, %c0_41] : memref<136x128xf32, #tpu.memory_space<vmem>>, vector<1x1xf32>
    %55 = vector.broadcast %54 : vector<1x1xf32> to vector<16x1xf32>
    %56 = arith.addf %53, %55 : vector<16x1xf32>
    %c0_42 = arith.constant 0 : index
    %c0_43 = arith.constant 0 : index
    %57 = vector.load %arg5[%c0_42, %c0_43] : memref<16x1xf32, #tpu.memory_space<vmem>>, vector<16x1xf32>
    tpu.vector_store %arg5[%c0_42, %c0_43], %56 {strides = array<i32>} : memref<16x1xf32, #tpu.memory_space<vmem>>, vector<16x1xf32>,
    return
  }
}

</mosaic_0001>

<bundles_post_ra>
// kernel: mlp_soft_class_forward.1
= control target key start
LH: loop header
LB: loop body
LE: loop exit
PB: predicated region body
PF: predicated region fallthrough
CT: control target
= control target key end

     0   :  { %10 = vsyncpa [#allocation5], 0  ;;  %s814_s18 = smov [#allocation4]   ;;  %s921_s0 = inlined_call_operand.vmem [shape: f32[16,32], index: 0, kind: input, shape index: {}]   ;;  %s922_s1 = inlined_call_operand.vmem [shape: f32[16,32], index: 1, kind: input, shape index: {}]   ;;  %s923_s2 = inlined_call_operand.vmem [shape: f32[16,4], index: 2, kind: input, shape index: {}]   ;;  %s924_s3 = inlined_call_operand.vmem [shape: f32[16,4], index: 3, kind: input, shape index: {}]   ;;  %s925_s4 = inlined_call_operand.hbm [shape: f32[136,128], index: 4, kind: input, shape index: {}]   ;;  %s926_s5 = inlined_call_operand.vmem [shape: f32[16,1], index: 5, kind: output, shape index: {}]  }
   0x1   :  { %s24_s19 = sshll.u32 %s814_s18, 4  ;;  %s790_s22 = scalar_lea.hbm %s925_s4, 2176  ;;  %s25_s19 = int_to_ptr.vmem [resolvable:$true] %s24_s19 }
   0x2   :  { %p791_p0 = scmp.ne.s32.totalorder %s925_s4, %s790_s22  ;;  %p794_p1 = scmp.lt.u32.totalorder %s790_s22, %s925_s4 }
   0x4   :  { %p796_p2 = pnand %p794_p1, %p791_p0 }
   0x6   :  { %799 = shalt.err (!%p796_p2)
}
   0x7   :  { %s800_s27 = scalar_lea.vmem %s25_s19, 2176  ;;  %p805_p4 = scmp.lt.s32.totalorder %s25_s19, %s25_s19 }
   0x8   :  { %p801_p3 = scmp.ne.s32.totalorder %s25_s19, %s800_s27  ;;  %p806_p5 = scmp.lt.s32.totalorder %s800_s27, %s800_s27 }
   0xa   :  { %p807_p6 = por %p806_p5, %p805_p4 }
   0xc   :  { %p808_p7 = pnand %p807_p6, %p801_p3 }
   0xe   :  { %811 = shalt.err (!%p808_p7)
}
   0xf   :  { %s815_s28 = smov 128   ;;  %s816_s29 = smov 8  }
  0x10   :  { %30 = dma.hbm_to_vmem [thread:$0]  %s925_s4, 2176, %s25_s19, [#allocation5], %s815_s28, %s815_s28, %s816_s29  }
  0x11   :  { %812 = dma.done.wait [#allocation5], 2176  }
  0x12   :  { %813 = vsyncadd [#allocation5], 4294965120  ;;  %vm43_vm0 = vcmask 64512   ;;  %v817_v0 = vmov 0.0   ;;  %vm36_vm1 = vcmask 261120   ;;  %v65_v1 = vld [vmem:[#allocation4] sm:$0xff] }
  0x13   :  { %44 = vst.msk [vmem:[#allocation3] sm:$0xff] %vm43_vm0, %v817_v0  ;;  %45 = vst.msk [vmem:[#allocation3 + $0x8] sm:$0xff] %vm43_vm0, %v817_v0  ;;  %v66_v2 = vld [vmem:[#allocation4 + $0x8] sm:$0xff]  ;;  %v67_v3 = vld [vmem:[#allocation4 + $0x10] sm:$0xff]  ;;  %vm50_vm2 = vcmask 31744   ;;  %vm284_vm3 = vcmask 130048  }
  0x14   :  { %46 = vst.msk [vmem:[#allocation3 + $0x10] sm:$0xff] %vm43_vm0, %v817_v0  ;;  %47 = vst.msk [vmem:[#allocation3 + $0x18] sm:$0xff] %vm43_vm0, %v817_v0  ;;  %v753_v4 = vpack.c.bf16 %v66_v2, %v65_v1  ;;  %v68_v5 = vld [vmem:[#allocation4 + $0x18] sm:$0xff]  ;;  %v34_v6 = vld [vmem:[%s921_s0] sm:$0xff]  ;;  %vm524_vm4 = vcmask 523264   ;;  %vm628_vm5 = vcmask 7168  }
  0x15   :  { %v35_v7 = vld [vmem:[%s921_s0 + $0x8] sm:$0xff]  ;;  %v757_v8 = vpack.c.bf16 %v68_v5, %v67_v3  ;;  %37 = vst.msk [vmem:[#allocation2] sm:$0xff] %vm36_vm1, %v34_v6  ;;  %v39_v9 = vld [vmem:[%s922_s1] sm:$0xff]  ;;  %v283_v17 = vld [vmem:[#allocation4 + $0x30] sm:$0xff] }
  0x16   :  { %38 = vst.msk [vmem:[#allocation2 + $0x8] sm:$0xff] %vm36_vm1, %v35_v7  ;;  %v40_v10 = vld [vmem:[%s922_s1 + $0x8] sm:$0xff]  ;;  %v175_v11 = vld [vmem:[#allocation4 + $0x20] sm:$0xff]  ;;  %754 = vmatprep.subr.bf16.mxu0 %v753_v4  ;;  %41 = vst.msk [vmem:[#allocation2 + $0x10] sm:$0xff] %vm36_vm1, %v39_v9 }
  0x17   :  { %42 = vst.msk [vmem:[#allocation2 + $0x18] sm:$0xff] %vm36_vm1, %v40_v10  ;;  %708 = vmatprep.subr.mxu1 %v175_v11  ;;  %v48_v12 = vld [vmem:[%s923_s2] sm:$0xff]  ;;  %v49_v13 = vld [vmem:[%s923_s2 + $0x8] sm:$0xff]  ;;  %756 = vmatpush3.bf16.msra.mxu0 %v753_v4  ;;  %v382_v27 = vld [vmem:[#allocation4 + $0x38] sm:$0xff]  ;;  %s818_s2 = smov 64  }
  0x18   :  { %v53_v14 = vld [vmem:[%s924_s3] sm:$0xff]  ;;  %709 = vmatpush3.msra.mxu1 %v175_v11  ;;  %51 = vst.msk [vmem:[#allocation3] sm:$0xff] %vm50_vm2, %v48_v12  ;;  %52 = vst.msk [vmem:[#allocation3 + $0x8] sm:$0xff] %vm50_vm2, %v49_v13  ;;  %v54_v15 = vld [vmem:[%s924_s3 + $0x8] sm:$0xff]  ;;  %758 = vmatprep.subr.bf16.mxu0 %v757_v8 }
  0x19   :  { %55 = vst.msk [vmem:[#allocation3 + $0x10] sm:$0xff] %vm50_vm2, %v53_v14  ;;  %v282_v16 = vld [vmem:[#allocation4 + $0x28] sm:$0xff]  ;;  %56 = vst.msk [vmem:[#allocation3 + $0x18] sm:$0xff] %vm50_vm2, %v54_v15  ;;  %v636_v28 = vld [vmem:[#allocation4 + $0x80] ss:$0 sm:$0xff] }
  0x1a   :  { %v761_v18 = vpack.c.bf16 %v283_v17, %v282_v16  ;;  %v641_v32 = vld [vmem:[#allocation4 + $0x81] ss:$0 sm:$0xff]  ;;  %v512_v55 = vld [vmem:[#allocation4 + $0x48] sm:$0xff]  ;;  %v513_v57 = vld [vmem:[#allocation4 + $0x50] sm:$0xff] }
  0x1b   :  { %760 = vmatpush3.bf16.msra.mxu0 %v757_v8  ;;  %v511_v54 = vld [vmem:[#allocation4 + $0x40] sm:$0xff]  ;;  %v514_v58 = vld [vmem:[#allocation4 + $0x58] sm:$0xff]  ;;  %v516_v61 = vld [vmem:[#allocation4 + $0x68] sm:$0xff] }
  0x1c   :  { %762 = vmatprep.subr.bf16.mxu1 %v761_v18  ;;  %v57_v19 = vld [vmem:[#allocation2] sm:$0xff]  ;;  %v765_v56 = vpack.c.bf16 %v512_v55, %v511_v54  ;;  %v769_v59 = vpack.c.bf16 %v514_v58, %v513_v57  ;;  %v517_v0 = vld [vmem:[#allocation4 + $0x70] sm:$0xff]  ;;  %v518_v1 = vld [vmem:[#allocation4 + $0x78] sm:$0xff] }
  0x1d   :  { %v58_v20 = vld [vmem:[#allocation2 + $0x8] sm:$0xff]  ;;  %702 = vmatprep.mubr.msk.f32.mxu0 %vm36_vm1, %v57_v19  ;;  %v59_v21 = vld [vmem:[#allocation2 + $0x10] sm:$0xff]  ;;  %v515_v60 = vld [vmem:[#allocation4 + $0x60] sm:$0xff]  ;;  %v777_v3 = vpack.c.bf16 %v518_v1, %v517_v0 }
  0x1e   :  { %703 = vmatmul.mubr.msk.f32.vlgmr.msra.gmra.mrb[0].mxu0 %vm36_vm1, %v58_v20  ;;  %v60_v25 = vld [vmem:[#allocation2 + $0x18] sm:$0xff]  ;;  %766 = vmatprep.subr.bf16.mxu0 %v765_v56  ;;  %v773_v62 = vpack.c.bf16 %v516_v61, %v515_v60  ;;  %v654_v11 = vld [vmem:[#allocation4 + $0x82] ss:$0 sm:$0xff] }
  0x1f   :  { %v61_v22 = vld [vmem:[#allocation3] sm:$0xff]  ;;  %v62_v23 = vld [vmem:[#allocation3 + $0x8] sm:$0xff]  ;;  %705 = vmatprep.mubr.msk.f32.mxu0 %vm36_vm1, %v59_v21  ;;  %768 = vmatpush3.bf16.msra.mxu0 %v765_v56 }
  0x20   :  { %v63_v24 = vld [vmem:[#allocation3 + $0x10] sm:$0xff]  ;;  %710 = vmatprep.mubr.msk.f32.mxu1 %vm43_vm0, %v61_v22  ;;  %v64_v26 = vld [vmem:[#allocation3 + $0x18] sm:$0xff]  ;;  %770 = vmatprep.subr.bf16.mxu0 %v769_v59  ;;  %v655_v21 = vld [vmem:[#allocation4 + $0x83] ss:$0 sm:$0xff] }
  0x21   :  { %711 = vmatmul.mubr.msk.f32.vlgmr.msra.gmra.mrb[0].mxu1 %vm43_vm0, %v62_v23 }
  0x22   :  { %713 = vmatprep.mubr.msk.f32.mxu1 %vm43_vm0, %v63_v24  ;;  %764 = vmatpush3.bf16.msra.mxu1 %v761_v18 }
  0x23   :  { %706 = vmatmul.mubr.msk.f32.gmra.mrb[2].mxu0 %vm36_vm1, %v60_v25  ;;  %726 = vmatprep.subr.mxu1 %v382_v27 }
  0x24   :  { %772 = vmatpush3.bf16.msra.mxu0 %v769_v59 }
  0x25   :  { %714 = vmatmul.mubr.msk.f32.gmra.mrb[2].mxu1 %vm43_vm0, %v64_v26  ;;  %774 = vmatprep.subr.bf16.mxu0 %v773_v62  ;;  %v658_v26 = vld [vmem:[#allocation4 + $0x84] ss:$0 sm:$0xff] }
  0x28   :  { %776 = vmatpush3.bf16.msra.mxu0 %v773_v62 }
  0x29   :  { %778 = vmatprep.subr.bf16.mxu0 %v777_v3 }
  0x2c   :  { %780 = vmatpush3.bf16.msra.mxu0 %v777_v3 }
  0xf1   :  { %v704_v29 = vpop.f32.mrb[0].mxu0 }
  0xf2   :  { %v158_v30 = vadd.f32 %v704_v29, %v636_v28  ;;  %v152_v31 = vpop.f32.mrb[1].mxu0 }
  0xf3   :  { %v153_v33 = vadd.f32 %v636_v28, %v152_v31 }
  0xf4   :  { %v712_v34 = vpop.f32.mrb[0].mxu1  ;;  %v172_v39 = vmax.f32 %v158_v30, 0.0 }
  0xf5   :  { %v259_v35 = vpop.f32.mrb[1].mxu1  ;;  %v171_v36 = vmax.f32 %v153_v33, 0.0  ;;  %v265_v49 = vadd.f32 %v712_v34, %v641_v32  ;;  %v659_v33 = vld [vmem:[#allocation4 + $0x85] ss:$0 sm:$0xff] }
  0xf6   :  { %v707_v37 = vpop.f32.mrb[2].mxu0  ;;  %v260_v38 = vadd.f32 %v641_v32, %v259_v35 }
  0xf7   :  { %v168_v40 = vadd.f32 %v707_v37, %v636_v28  ;;  %v162_v41 = vpop.f32.mrb[3].mxu0  ;;  %720 = vmatprep.mubr.msk.f32.mxu1 %vm284_vm3, %v171_v36  ;;  %v279_v51 = vmax.f32 %v265_v49, 0.0 }
  0xf8   :  { %v163_v42 = vadd.f32 %v636_v28, %v162_v41  ;;  %v715_v43 = vpop.f32.mrb[2].mxu1  ;;  %721 = vmatmul.mubr.msk.f32.vlgmr.msra.gmra.mrb[4].mxu1 %vm284_vm3, %v172_v39  ;;  %v278_v46 = vmax.f32 %v260_v38, 0.0 }
  0xf9   :  { %v269_v44 = vpop.f32.mrb[3].mxu1  ;;  %727 = vmatpush3.msra.mxu1 %v382_v27  ;;  %v174_v48 = vmax.f32 %v168_v40, 0.0  ;;  %v275_v52 = vadd.f32 %v715_v43, %v641_v32 }
  0xfa   :  { %v173_v45 = vmax.f32 %v163_v42, 0.0  ;;  %v270_v47 = vadd.f32 %v641_v32, %v269_v44 }
  0xfb   :  { %v281_v53 = vmax.f32 %v275_v52, 0.0 }
  0xfc   :  { %723 = vmatprep.mubr.msk.f32.mxu1 %vm284_vm3, %v173_v45  ;;  %v280_v50 = vmax.f32 %v270_v47, 0.0 }
  0xfd   :  { %724 = vmatmul.mubr.msk.f32.gmra.mrb[6].mxu1 %vm284_vm3, %v174_v48 }
  0xfe   :  { %728 = vmatprep.mubr.msk.f32.mxu1 %vm43_vm0, %v278_v46 }
 0x101   :  { %729 = vmatmul.mubr.msk.f32.vlgmr.msra.gmra.mrb[4].mxu1 %vm43_vm0, %v279_v51 }
 0x102   :  { %731 = vmatprep.mubr.msk.f32.mxu1 %vm43_vm0, %v280_v50 }
 0x105   :  { %732 = vmatmul.mubr.msk.f32.gmra.mrb[8].mxu1 %vm43_vm0, %v281_v53 }
 0x1d0   :  { %v725_v63 = vpop.f32.mrb[6].mxu1 }
 0x1d1   :  { %v373_v2 = vpop.f32.mrb[7].mxu1 }
 0x1d2   :  { %482 = vrot.lane.b32.xlu0 %v373_v2, %s818_s2 }
 0x1d4   :  { %v730_v4 = vpop.f32.mrb[4].mxu1 }
 0x1d5   :  { %v461_v5 = vpop.f32.mrb[5].mxu1 }
 0x1d6   :  { %484 = vrot.lane.b32.xlu0 %v725_v63, %s818_s2 }
 0x1d8   :  { %v733_v6 = vpop.f32.mrb[8].mxu1 }
 0x1d9   :  { %v471_v7 = vpop.f32.mrb[9].mxu1 }
 0x1da   :  { %494 = vrot.lane.b32.xlu1 %v471_v7, %s818_s2 }
 0x1de   :  { %496 = vrot.lane.b32.xlu1 %v733_v6, %s818_s2 }
 0x244   :  { %v483_v8 = vpop.permute.xlu0 %482 }
 0x245   :  { %v782_v9 = vadd.f32 %v483_v8, %v461_v5 }
 0x248   :  { %v485_v10 = vpop.permute.xlu0 %484 }
 0x249   :  { %v781_v14 = vadd.f32 %v730_v4, %v485_v10 }
 0x24c   :  { %v495_v12 = vpop.permute.xlu1 %494 }
 0x24d   :  { %v500_v13 = vadd.f32 %v782_v9, %v495_v12 }
 0x24f   :  { %v507_v15 = vadd.f32 %v654_v11, %v500_v13 }
 0x250   :  { %v497_v16 = vpop.permute.xlu1 %496 }
 0x251   :  { %v509_v17 = vmax.f32 %v507_v15, 0.0  ;;  %v501_v18 = vadd.f32 %v781_v14, %v497_v16 }
 0x253   :  { %v508_v19 = vadd.f32 %v654_v11, %v501_v18  ;;  %750 = vmatprep.mubr.msk.f32.mxu0 %vm524_vm4, %v509_v17 }
 0x255   :  { %v510_v20 = vmax.f32 %v508_v19, 0.0 }
 0x257   :  { %751 = vmatmul.mubr.msk.f32.vlgmr.msra.gmra.mrb[4].mxu0 %vm524_vm4, %v510_v20 }
 0x32a   :  { %v752_v22 = vpop.f32.mrb[4].mxu0 }
 0x32b   :  { %v603_v23 = vadd.f32 %v752_v22, %v655_v21  ;;  %v597_v24 = vpop.f32.mrb[5].mxu0 }
 0x32c   :  { %v598_v25 = vadd.f32 %v655_v21, %v597_v24 }
 0x32d   :  { %v607_v27 = vmax.f32 %v603_v23, 0.0 }
 0x32e   :  { %v606_v28 = vmax.f32 %v598_v25, 0.0 }
 0x32f   :  { %v614_v29 = vmul.f32 %v658_v26, %v607_v27 }
 0x330   :  { %v613_v30 = vmul.f32 %v658_v26, %v606_v28 }
 0x331   :  { %v618_v31 = vsel %vm36_vm1, %v614_v29, 0.0 }
 0x332   :  { %619 = vadd.xlane.f32.xlu1 %v618_v31  ;;  %v615_v32 = vsel %vm36_vm1, %v613_v30, 0.0 }
 0x333   :  { %616 = vadd.xlane.f32.xlu0 %v615_v32 }
 0x3bf   :  { %v620_v34 = vpop.xlane.xlu1 %619 }
 0x3c0   :  { %v627_v35 = vadd.f32 %v659_v33, %v620_v34  ;;  %v617_v36 = vpop.xlane.xlu0 %616 }
 0x3c1   :  { %v626_v37 = vadd.f32 %v659_v33, %v617_v36 }
 0x3c2   :  { %630 = vst.msk [vmem:[%s926_s5 + $0x8] sm:$0xff] %vm628_vm5, %v627_v35 }
 0x3c3   :  { %629 = vst.msk [vmem:[%s926_s5] sm:$0xff] %vm628_vm5, %v626_v37 }
 0x3c4   :  { %635 = vsyncpa [#allocation5], 1 }

</bundles_post_ra>
